<compile_context>
chip_gen: v7x
topology: tpu7x:2x2x1
jax: 0.10.0
libtpu: 0.0.40
codegen_flags: <defaults>
</compile_context>

<pallas_src>
import jax
import jax.numpy as jnp
from jax.experimental import pallas as pl
from jax.experimental.pallas import tpu as pltpu


def _drop_path_kernel(x_ref, scale_ref, o_ref):
    """Elementwise x * per-row-scale on one (TB, TN) tile.

    x_ref     : VMEM (TB, TN) tile of the [rows, cols]-flattened input
    scale_ref : VMEM (TB, 1)  per-row factor (x.dtype): 0.0 (dropped) or 1/(1-p)
    o_ref     : VMEM (TB, TN) output tile
    """
    o_ref[...] = x_ref[...] * scale_ref[...]


def _fold_factor(b, n):
    """Smallest r with n % r == 0, (n//r) % 128 == 0, (b*r) % 8 == 0, else 1."""
    for cand in range(1, min(n, 256) + 1):
        if n % cand == 0 and (n // cand) % 128 == 0 and (b * cand) % 8 == 0:
            return cand
    return 1


def drop_path(x, drop_prob, key, *, training=True):
    """JAX/Pallas equivalent of DropPath.forward.

    x         : jnp.ndarray of shape [B, ...]
    drop_prob : python float in [0, 1)
    key       : jax.random key for the per-sample Bernoulli draws
    training  : eval mode returns x unchanged (identity), like nn.Module.eval()
    """
    assert 1.0 > drop_prob >= 0.0
    if not training or drop_prob == 0.0:
        return x

    orig_shape = x.shape
    b = orig_shape[0]
    n = 1
    for d in orig_shape[1:]:
        n *= d
    if b == 0 or n == 0:
        return x

    # Per-sample keep mask / scale (tiny: B values), matching
    # `torch.rand((B,1,...)) >= drop_prob` then `x.div(1 - p) * mask`.
    keep = jax.random.uniform(key, (b,), dtype=jnp.float32) >= jnp.float32(drop_prob)
    scale = (keep.astype(jnp.float32) * jnp.float32(1.0 / (1.0 - drop_prob))).astype(x.dtype)

    # Fold the flat [B, N] view into an (8,128)-friendly [B*r, N/r] view when
    # possible (contiguous reshape: free). Row i of the folded view belongs to
    # sample i // r, so the scale is simply repeated r times.
    r = _fold_factor(b, n)
    rows, cols = b * r, n // r
    x2 = x.reshape(rows, cols)
    scale2 = (jnp.repeat(scale, r) if r > 1 else scale).reshape(rows, 1)

    itemsize = jnp.dtype(x.dtype).itemsize
    lane, sub = 128, 8
    target_bytes = 4 << 20  # ~4 MiB blocks: roofline-saturating, few grid steps

    # Lane-dim tile: multiple of 128 (ragged tails handled by Pallas edge-block
    # padding); only a <128-wide array falls back to the full (tiny) last dim.
    if cols >= lane:
        tn_cap = max(lane, (target_bytes // (sub * itemsize)) // lane * lane)
        tn = min((cols // lane) * lane, tn_cap)
    else:
        tn = cols

    # Sublane-dim tile: multiple of 8 filling toward the target block size.
    if rows >= sub:
        tb_cap = max(sub, (target_bytes // max(tn * itemsize, 1)) // sub * sub)
        tb = min((rows // sub) * sub, tb_cap)
    else:
        tb = rows  # B < 8 and no fold found: full (sublane-padded) dim

    # Keep >= 2 grid points on big-enough tensors so both v7x TensorCores work.
    grid_r, grid_c = pl.cdiv(rows, tb), pl.cdiv(cols, tn)
    if grid_r * grid_c < 2 and rows * cols * itemsize >= (1 << 20):
        if tb >= 2 * sub:
            tb = ((tb // 2 + sub - 1) // sub) * sub
        elif tn >= 2 * lane:
            tn = ((tn // 2 + lane - 1) // lane) * lane
        grid_r, grid_c = pl.cdiv(rows, tb), pl.cdiv(cols, tn)

    # Double-buffered input + output tiles (+ tiny scale tiles) with headroom;
    # explicit so v5e's 16 MiB default scoped VMEM doesn't reject 4 MiB tiles.
    tile_bytes = tb * tn * itemsize
    vmem_limit = int(min(48 << 20, max(16 << 20, 5 * tile_bytes)))

    out2 = pl.pallas_call(
        _drop_path_kernel,
        out_shape=jax.ShapeDtypeStruct((rows, cols), x.dtype),
        grid=(grid_r, grid_c),
        in_specs=[
            pl.BlockSpec((tb, tn), lambda i, j: (i, j)),
            pl.BlockSpec((tb, 1), lambda i, j: (i, 0)),
        ],
        out_specs=pl.BlockSpec((tb, tn), lambda i, j: (i, j)),
        compiler_params=pltpu.CompilerParams(
            dimension_semantics=("parallel", "parallel"),
            vmem_limit_bytes=vmem_limit,
        ),
        cost_estimate=pl.CostEstimate(
            flops=rows * cols,
            transcendentals=0,
            bytes_accessed=2 * rows * cols * itemsize + rows * itemsize,
        ),
    )(x2, scale2)

    return out2.reshape(orig_shape)


if __name__ == "__main__":
    root = jax.random.PRNGKey(0)
    x_key, drop_key = jax.random.split(root)

    # NCHW input, small shapes: batch=2, channels=4, spatial=16x16
    x = jax.random.normal(x_key, (2, 4, 16, 16), dtype=jnp.float32)
    drop_prob = 0.5

    # Training path (the Pallas kernel).
    y = drop_path(x, drop_prob, drop_key, training=True)
    y = jax.block_until_ready(y)
    assert y.shape == x.shape and y.dtype == x.dtype

    # Semantics check: each sample is either all-zeros or x / (1 - p).
    scaled = x / (1.0 - drop_prob)
    for i in range(x.shape[0]):
        yi = y[i]
        is_dropped = bool(jnp.all(yi == 0.0))
        is_kept = bool(jnp.allclose(yi, scaled[i], atol=1e-6))
        assert is_dropped or is_kept, "per-sample drop-path semantics violated"

    # Eval path is identity (like module.eval()).
    y_eval = jax.block_until_ready(drop_path(x, drop_prob, drop_key, training=False))
    assert bool(jnp.array_equal(y_eval, x))

    print("KERNEL_OK")
</pallas_src>

<mosaic_0001>
module attributes {stable_mosaic.version = 11 : i64} {
  func.func @_drop_path_kernel(%arg0: i32, %arg1: i32, %arg2: memref<8x256xf32, #tpu.memory_space<vmem>>, %arg3: memref<8x1xf32, #tpu.memory_space<vmem>>, %arg4: memref<8x256xf32, #tpu.memory_space<vmem>>) attributes {dimension_semantics = [#tpu.dimension_semantics<parallel>, #tpu.dimension_semantics<parallel>], iteration_bounds = array<i64: 1, 1>, scalar_prefetch = 0 : i64, scratch_operands = 0 : i64, tpu.core_type = #tpu.core_type<tc>, window_params = [{transform_indices = @transform_0, window_bounds = array<i64: 8, 256>}, {transform_indices = @transform_1, window_bounds = array<i64: 8, 1>}, {transform_indices = @transform_2, window_bounds = array<i64: 8, 256>}]} {
    %c0 = arith.constant 0 : index
    %c0_0 = arith.constant 0 : index
    %0 = vector.load %arg2[%c0, %c0_0] : memref<8x256xf32, #tpu.memory_space<vmem>>, vector<8x256xf32>
    %c0_1 = arith.constant 0 : index
    %c0_2 = arith.constant 0 : index
    %1 = vector.load %arg3[%c0_1, %c0_2] : memref<8x1xf32, #tpu.memory_space<vmem>>, vector<8x1xf32>
    %2 = vector.broadcast %1 : vector<8x1xf32> to vector<8x256xf32>
    %3 = arith.mulf %0, %2 : vector<8x256xf32>
    %c0_3 = arith.constant 0 : index
    %c0_4 = arith.constant 0 : index
    %4 = vector.load %arg4[%c0_3, %c0_4] : memref<8x256xf32, #tpu.memory_space<vmem>>, vector<8x256xf32>
    tpu.vector_store %arg4[%c0_3, %c0_4], %3 {strides = array<i32>} : memref<8x256xf32, #tpu.memory_space<vmem>>, vector<8x256xf32>,
    return
  }
  func.func @transform_0(%arg0: i32, %arg1: i32) -> (i32, i32) {
    %c0_i32 = arith.constant 0 : i32
    return %arg0, %arg1 : i32, i32
  }
  func.func @transform_1(%arg0: i32, %arg1: i32) -> (i32, i32) {
    %c0_i32 = arith.constant 0 : i32
    %c0_i32_0 = arith.constant 0 : i32
    return %arg0, %c0_i32 : i32, i32
  }
  func.func @transform_2(%arg0: i32, %arg1: i32) -> (i32, i32) {
    %c0_i32 = arith.constant 0 : i32
    return %arg0, %arg1 : i32, i32
  }
}

</mosaic_0001>

<bundles_post_ra>
// kernel: tpu_custom_call.1
= control target key start
LH: loop header
LB: loop body
LE: loop exit
PB: predicated region body
PF: predicated region fallthrough
CT: control target
= control target key end

     0   :  { %7 = vsyncpa [#allocation3], 0  ;;  %s148_s0 = inlined_call_operand.hbm [shape: f32[8,256], index: 0, kind: input, shape index: {}]   ;;  %s149_s1 = inlined_call_operand.vmem [shape: f32[8,1], index: 1, kind: input, shape index: {}]   ;;  %s150_s2 = inlined_call_operand.hbm [shape: f32[8,256], index: 2, kind: output, shape index: {}]  }
   0x1   :  { %8 = vsyncpa [#allocation4], 0  ;;  %s103_s9 = smov [#allocation2]   ;;  %s55_s13 = scalar_lea.hbm %s148_s0, 256 }
   0x2   :  { %s15_s10 = sshll.u32 %s103_s9, 4  ;;  %p56_p0 = scmp.ne.s32.totalorder %s148_s0, %s55_s13  ;;  %s16_s10 = int_to_ptr.vmem [resolvable:$true] %s15_s10 }
   0x3   :  { %p59_p1 = scmp.lt.u32.totalorder %s55_s13, %s148_s0 }
   0x5   :  { %p61_p2 = pnand %p59_p1, %p56_p0 }
   0x7   :  { %64 = shalt.err (!%p61_p2)
}
   0x8   :  { %s65_s18 = scalar_lea.vmem %s16_s10, 256  ;;  %p70_p4 = scmp.lt.s32.totalorder %s16_s10, %s16_s10 }
   0x9   :  { %p66_p3 = scmp.ne.s32.totalorder %s16_s10, %s65_s18  ;;  %p71_p5 = scmp.lt.s32.totalorder %s65_s18, %s65_s18 }
   0xb   :  { %p72_p6 = por %p71_p5, %p70_p4 }
   0xd   :  { %p73_p7 = pnand %p72_p6, %p66_p3 }
   0xf   :  { %76 = shalt.err (!%p73_p7)
}
  0x10   :  { %18 = dma.hbm_to_vmem [thread:$0]  %s148_s0, 256, %s16_s10, [#allocation3]  }
  0x11   :  { %99 = dma.done.wait [#allocation3], 256  }
  0x12   :  { %100 = vsyncadd [#allocation3], 4294967040  ;;  %v104_v0 = vmov 0   ;;  %v26_v1 = vld [vmem:[%s149_s1] sm:$0xff]  ;;  %v25_v3 = vld [vmem:[#allocation2 + $0x8] sm:$0xff]  ;;  %s105_s23 = smov [#allocation5]  }
  0x13   :  { %54 = vset.pattern.permute.xlu0 %v104_v0  ;;  %v24_v2 = vld [vmem:[#allocation2] sm:$0xff]  ;;  %s42_s24 = sshll.u32 %s105_s23, 4  ;;  %s43_s24 = int_to_ptr.vmem [resolvable:$true] %s42_s24 }
  0x14   :  { %29 = vperm.xlu0 %54, %v26_v1   ;;  %s77_s0 = scalar_lea.vmem %s43_s24, 256  ;;  %p82_p9 = scmp.lt.s32.totalorder %s43_s24, %s43_s24 }
  0x15   :  { %p78_p8 = scmp.ne.s32.totalorder %s43_s24, %s77_s0  ;;  %p83_p10 = scmp.lt.s32.totalorder %s77_s0, %s77_s0 }
  0x17   :  { %p84_p11 = por %p83_p10, %p82_p9 }
  0x19   :  { %p85_p12 = pnand %p84_p11, %p78_p8 }
  0x93   :  { %v30_v4 = vpop.permute.xlu0 %29 }
  0x94   :  { %v32_v5 = vmul.f32 %v30_v4, %v24_v2  ;;  %v33_v6 = vmul.f32 %v30_v4, %v25_v3 }
  0x96   :  { %34 = vst [vmem:[#allocation5] sm:$0xff] %v32_v5  ;;  %35 = vst [vmem:[#allocation5 + $0x8] sm:$0xff] %v33_v6 }
  0x97   :  { %88 = shalt.err (!%p85_p12)
}
  0x98   :  { %s89_s26 = scalar_lea.hbm %s150_s2, 256 }
  0x99   :  { %p90_p13 = scmp.ne.s32.totalorder %s150_s2, %s89_s26  ;;  %p93_p0 = scmp.lt.u32.totalorder %s89_s26, %s150_s2 }
  0x9b   :  { %p95_p1 = pnand %p93_p0, %p90_p13 }
  0x9d   :  { %98 = shalt.err (!%p95_p1)
}
  0x9e   :  { %45 = dma.vmem_to_hbm [thread:$0]  %s43_s24, 256, %s150_s2, [#allocation4]  }
  0x9f   :  { %101 = dma.done.wait [#allocation4], 256  }
  0xa0   :  { %102 = vsyncadd [#allocation4], 4294967040 }
  0xa1   :  { %49 = vsyncpa [#allocation3], 1 }
  0xa2   :  { %50 = vsyncpa [#allocation4], 1 }

</bundles_post_ra>
